<compile_context>
chip_gen: v7x
topology: tpu7x:2x2x1
jax: 0.10.0
libtpu: 0.0.40
codegen_flags: <defaults>
</compile_context>

<pallas_src>
import functools

import jax
import jax.numpy as jnp
from jax.experimental import pallas as pl
from jax.experimental.pallas import tpu as pltpu


def make_branching_kernel(n_layers):
    """Kernel body. refs = [x_tile, (Wt, b) * (n_layers-1), w_last, b_last, out_row]."""

    def kernel(*refs):
        x_ref = refs[0]
        out_ref = refs[-1]
        params = refs[1:-1]
        w_last_ref, b_last_ref = params[-2], params[-1]

        if n_layers == 1:
            # Single (mean-folded) layer acts directly on the streamed tile.
            row = jax.lax.dot_general(
                w_last_ref[...], x_ref[...],                # (1, d0), (tm, d0)
                dimension_numbers=(((1,), (1,)), ((), ())),
                preferred_element_type=jnp.float32)         # (1, tm)
            out_ref[...] = row + b_last_ref[...]
            return

        # First hidden layer: contract the feature dim of BOTH operands
        # (transposed-RHS matmul, MXU-native like q @ k^T) so the intermediate
        # comes out lane-dense as (d1, tm) with candidates on the lane axis.
        w0_ref, b0_ref = params[0], params[1]
        h = jax.lax.dot_general(
            w0_ref[...], x_ref[...],                        # (d1, d0), (tm, d0)
            dimension_numbers=(((1,), (1,)), ((), ())),
            preferred_element_type=jnp.float32)             # (d1, tm)
        h = jnp.maximum(h + b0_ref[...], 0.0)               # (d1,1) lane-broadcast

        # Remaining hidden layers: standard (d_out, d_in) @ (d_in, tm).
        for i in range(1, n_layers - 1):
            w_ref, b_ref = params[2 * i], params[2 * i + 1]
            h = jax.lax.dot_general(
                w_ref[...], h,
                dimension_numbers=(((1,), (0,)), ((), ())),
                preferred_element_type=jnp.float32)
            h = jnp.maximum(h + b_ref[...], 0.0)

        # Mean-folded last layer (f32): (1, d_last) @ (d_last, tm) -> (1, tm).
        row = jax.lax.dot_general(
            w_last_ref[...], h,
            dimension_numbers=(((1,), (0,)), ((), ())),
            preferred_element_type=jnp.float32)
        out_ref[...] = row + b_last_ref[...]

    return kernel


@functools.partial(jax.jit, static_argnames=("tm",))
def tree_gate_forward(gate_params, branch_params, cands_state_mat,
                      node_state, mip_state, *, tm=16384):
    f32 = jnp.float32
    n_layers = len(branch_params)
    depth = len(gate_params)

    # ---- GatingNet (tiny; plain XLA, all f32) ----
    tree_state = jnp.concatenate(
        [node_state.astype(f32), mip_state.astype(f32)])[None, :]
    h = tree_state
    for d, (w, b) in enumerate(gate_params):
        h = h @ w + b
        if d < depth - 1:
            h = jnp.maximum(h, 0.0)
    attn = jax.nn.sigmoid(h)[0]                             # (n_attn_units,)

    # ---- Fold attention + final feature-mean into transposed f32 weights ----
    # NOTE: if the gating inputs repeat across calls, cache `folded` outside
    # this function to skip these dozen tiny XLA ops in the small-n regime.
    folded = []
    start = 0
    for i, (w, b) in enumerate(branch_params):
        d_in, d_out = w.shape
        a = attn[start:start + d_in]
        start += d_in
        w_s = a[:, None] * w.astype(f32)                    # (d_in, d_out)
        if i == n_layers - 1:
            folded.append(w_s.mean(axis=1, keepdims=True).T)        # (1, d_in)
            folded.append(jnp.mean(b).reshape(1, 1).astype(f32))    # (1, 1)
        else:
            folded.append(w_s.T)                                    # (d_out, d_in)
            folded.append(b.astype(f32).reshape(d_out, 1))          # (d_out, 1)

    # ---- Stream candidates over a 1-D pipelined grid (no pre-cast, no pad) --
    n_cands, d0 = cands_state_mat.shape
    n_tiles = pl.cdiv(n_cands, tm)                          # ragged edge OK

    in_specs = [pl.BlockSpec((tm, d0), lambda i: (i, 0))]
    for p in folded:                     # resident params, constant block idx
        in_specs.append(pl.BlockSpec(p.shape, lambda i: (0, 0)))
    # TODO(synk): pipeline_mode=pl.Buffered(1) on the constant-index param
    # specs would save a few KiB of double-buffering; unneeded at this tm.

    flops = 2 * n_cands * sum(int(w.shape[0]) * int(w.shape[1])
                              for w, _ in branch_params)
    bytes_accessed = (n_cands * d0 * 4 + n_cands * 4
                      + sum(int(p.size) * 4 for p in folded))

    out_row = pl.pallas_call(
        make_branching_kernel(n_layers),
        out_shape=jax.ShapeDtypeStruct((1, n_cands), jnp.float32),
        grid=(n_tiles,),
        in_specs=in_specs,
        out_specs=pl.BlockSpec((1, tm), lambda i: (0, i)),
        compiler_params=pltpu.CompilerParams(
            dimension_semantics=("parallel",),
            vmem_limit_bytes=48 * 1024 * 1024),
        cost_estimate=pl.CostEstimate(
            flops=flops, transcendentals=0, bytes_accessed=bytes_accessed),
    )(cands_state_mat.astype(f32), *folded)

    return out_row.reshape(n_cands, 1)                      # (n_cands, 1)


class TreeGateBranchingNetPallas:
    """JAX/Pallas re-implementation of TreeGateBranchingNet (norm='none')."""

    def __init__(self, branch_size, tree_state_size, dim_reduce_factor,
                 infimum=8, norm='none', depth=2, hidden_size=128, key=None):
        assert norm == 'none', "only norm='none' (Identity) is implemented"
        # TODO(synk): batch/instance/layer norm variants are not implemented
        # (the module default is 'none').
        self.branch_size = branch_size
        self.tree_state_size = tree_state_size
        self.dim_reduce_factor = dim_reduce_factor
        self.infimum = infimum
        self.depth = depth
        self.hidden_size = hidden_size

        # Layer-count logic from the PyTorch __init__.
        self.n_layers = 0
        unit_count = infimum
        while unit_count < branch_size:
            unit_count *= dim_reduce_factor
            self.n_layers += 1
        assert self.n_layers >= 1, "degenerate config (infimum >= branch_size)"

        if key is None:
            key = jax.random.PRNGKey(0)

        def linear_params(k, d_in, d_out):
            k_w, k_b = jax.random.split(k)
            lim = 1.0 / jnp.sqrt(jnp.float32(d_in))
            w = jax.random.uniform(k_w, (d_in, d_out), jnp.float32, -lim, lim)
            b = jax.random.uniform(k_b, (1, d_out), jnp.float32, -lim, lim)
            return w, b

        # BranchingNet parameters.
        self.n_units = []
        branch_params = []
        input_dim = hidden_size
        for _ in range(self.n_layers):
            output_dim = int(input_dim / dim_reduce_factor)
            self.n_units.append(input_dim)
            key, sub = jax.random.split(key)
            branch_params.append(linear_params(sub, input_dim, output_dim))
            input_dim = output_dim
        self.branch_params = tuple(branch_params)
        self.n_attentional_units = sum(self.n_units)

        # GatingNet parameters.
        gate_params = []
        if depth == 1:
            key, sub = jax.random.split(key)
            gate_params.append(
                linear_params(sub, tree_state_size, self.n_attentional_units))
        else:
            key, sub = jax.random.split(key)
            gate_params.append(linear_params(sub, tree_state_size, hidden_size))
            for _ in range(depth - 2):
                key, sub = jax.random.split(key)
                gate_params.append(linear_params(sub, hidden_size, hidden_size))
            key, sub = jax.random.split(key)
            gate_params.append(
                linear_params(sub, hidden_size, self.n_attentional_units))
        self.gate_params = tuple(gate_params)

    def __call__(self, cands_state_mat, node_state, mip_state, tm=None):
        n_cands = cands_state_mat.shape[0]
        if tm is None:
            # ~2 MiB of f32 candidate bytes per grid step (tm*128 B) amortizes
            # the ~0.35 us per-step pipeline overhead. Cap 16384: the
            # double-buffered, lane-padded (tm, 32) f32 block costs tm*1 KiB
            # (16 MiB) -> well under scoped VMEM on v5e/v6e/v7x with the
            # explicit 48 MiB limit. The /2 split keeps >=2 tiles so both v7x
            # TensorCores get work. Note: tm depends on n_cands, so each
            # distinct n_cands recompiles (already true because shapes differ).
            tm = min(16384, max(128, ((pl.cdiv(n_cands, 2) + 127) // 128) * 128))
        return tree_gate_forward(self.gate_params, self.branch_params,
                                 cands_state_mat, node_state, mip_state, tm=tm)

    # Pure-JAX f32 reference (un-folded math) for correctness checking.
    def reference(self, cands_state_mat, node_state, mip_state):
        tree_state = jnp.concatenate(
            [node_state.astype(jnp.float32), mip_state.astype(jnp.float32)])[None, :]
        h = tree_state
        for d, (w, b) in enumerate(self.gate_params):
            h = h @ w + b
            if d < self.depth - 1:
                h = jnp.maximum(h, 0.0)
        attn = jax.nn.sigmoid(h)
        x = cands_state_mat.astype(jnp.float32)
        start = 0
        for i, (w, b) in enumerate(self.branch_params):
            end = start + self.n_units[i]
            x = x * attn[:, start:end]
            x = x @ w + b
            if i < len(self.branch_params) - 1:
                x = jnp.maximum(x, 0.0)
            start = end
        return jnp.mean(x, axis=1, keepdims=True)


if __name__ == "__main__":
    # Config consistent with the module's __init__:
    #   hidden_size=32, dim_reduce_factor=2, infimum=8, branch_size=32
    #   -> n_layers=2, branching layers 32->16 (ReLU), 16->8
    #   -> n_attentional_units = 32 + 16 = 48
    #   GatingNet (depth=2): Linear(16,32) + ReLU + Linear(32,48) + Sigmoid
    branch_size = 32
    hidden_size = 32
    dim_reduce_factor = 2
    node_state_size, mip_state_size = 6, 10
    tree_state_size = node_state_size + mip_state_size
    n_cands = 700   # exercises 2 grid tiles + a ragged (masked) last block

    key = jax.random.PRNGKey(0)
    k_params, k_cands, k_node, k_mip = jax.random.split(key, 4)

    net = TreeGateBranchingNetPallas(
        branch_size=branch_size,
        tree_state_size=tree_state_size,
        dim_reduce_factor=dim_reduce_factor,
        infimum=8,
        norm='none',
        depth=2,
        hidden_size=hidden_size,
        key=k_params,
    )

    cands_state_mat = jax.random.normal(k_cands, (n_cands, hidden_size), jnp.float32)
    node_state = jax.random.normal(k_node, (node_state_size,), jnp.float32)
    mip_state = jax.random.normal(k_mip, (mip_state_size,), jnp.float32)

    out = net(cands_state_mat, node_state, mip_state)
    out = jax.block_until_ready(out)

    ref = net.reference(cands_state_mat, node_state, mip_state)
    assert out.shape == (n_cands, 1), out.shape
    # f32 end-to-end now (MXU default precision still rounds operands per
    # pass), so error is typically <1e-2; keep a safe tolerance.
    assert jnp.allclose(out, ref, atol=3e-2, rtol=3e-2), (
        float(jnp.max(jnp.abs(out - ref))))

    print("KERNEL_OK")
</pallas_src>

<mosaic_0001>
module attributes {stable_mosaic.version = 11 : i64} {
  func.func @kernel(%arg0: i32, %arg1: memref<384x32xf32, #tpu.memory_space<vmem>>, %arg2: memref<16x32xf32, #tpu.memory_space<vmem>>, %arg3: memref<16x1xf32, #tpu.memory_space<vmem>>, %arg4: memref<1x16xf32, #tpu.memory_space<vmem>>, %arg5: memref<1x1xf32, #tpu.memory_space<vmem>>, %arg6: memref<1x384xf32, #tpu.memory_space<vmem>>) attributes {dimension_semantics = [#tpu.dimension_semantics<parallel>], iteration_bounds = array<i64: 2>, scalar_prefetch = 0 : i64, scratch_operands = 0 : i64, tpu.core_type = #tpu.core_type<tc>, window_params = [{transform_indices = @transform_0, window_bounds = array<i64: 384, 32>}, {pipeline_mode = #tpu.pipeline_mode<synchronous>, transform_indices = @transform_1, window_bounds = array<i64: 16, 32>}, {pipeline_mode = #tpu.pipeline_mode<synchronous>, transform_indices = @transform_2, window_bounds = array<i64: 16, 1>}, {pipeline_mode = #tpu.pipeline_mode<synchronous>, transform_indices = @transform_3, window_bounds = array<i64: 1, 16>}, {pipeline_mode = #tpu.pipeline_mode<synchronous>, transform_indices = @transform_4, window_bounds = array<i64: 1, 1>}, {transform_indices = @transform_5, window_bounds = array<i64: 1, 384>}]} {
    %c0 = arith.constant 0 : index
    %c0_0 = arith.constant 0 : index
    %0 = vector.load %arg2[%c0, %c0_0] : memref<16x32xf32, #tpu.memory_space<vmem>>, vector<16x32xf32>
    %c0_1 = arith.constant 0 : index
    %c0_2 = arith.constant 0 : index
    %1 = vector.load %arg1[%c0_1, %c0_2] : memref<384x32xf32, #tpu.memory_space<vmem>>, vector<384x32xf32>
    %cst = arith.constant dense<0.000000e+00> : vector<16x384xf32>
    %2 = tpu.matmul %0, %1, %cst {dimension_numbers = #tpu.dot_dimension_numbers<[1], [1], [0], [0], [0, 0, 1, 0], [], []>} : vector<16x32xf32>, vector<384x32xf32>, vector<16x384xf32> -> vector<16x384xf32>
    %c0_3 = arith.constant 0 : index
    %c0_4 = arith.constant 0 : index
    %3 = vector.load %arg3[%c0_3, %c0_4] : memref<16x1xf32, #tpu.memory_space<vmem>>, vector<16x1xf32>
    %4 = vector.broadcast %3 : vector<16x1xf32> to vector<16x384xf32>
    %5 = arith.addf %2, %4 : vector<16x384xf32>
    %cst_5 = arith.constant 0.000000e+00 : f32
    %6 = vector.broadcast %cst_5 : f32 to vector<16x384xf32>
    %7 = arith.maximumf %5, %6 : vector<16x384xf32>
    %c0_6 = arith.constant 0 : index
    %c0_7 = arith.constant 0 : index
    %8 = vector.load %arg4[%c0_6, %c0_7] : memref<1x16xf32, #tpu.memory_space<vmem>>, vector<1x16xf32>
    %cst_8 = arith.constant dense<0.000000e+00> : vector<1x384xf32>
    %9 = tpu.matmul %8, %7, %cst_8 {dimension_numbers = #tpu.dot_dimension_numbers<[1], [0], [0], [1], [0, 0, 1, 1], [], []>} : vector<1x16xf32>, vector<16x384xf32>, vector<1x384xf32> -> vector<1x384xf32>
    %c0_9 = arith.constant 0 : index
    %c0_10 = arith.constant 0 : index
    %10 = vector.load %arg5[%c0_9, %c0_10] : memref<1x1xf32, #tpu.memory_space<vmem>>, vector<1x1xf32>
    %11 = vector.broadcast %10 : vector<1x1xf32> to vector<1x384xf32>
    %12 = arith.addf %9, %11 : vector<1x384xf32>
    %c0_11 = arith.constant 0 : index
    %c0_12 = arith.constant 0 : index
    %13 = vector.load %arg6[%c0_11, %c0_12] : memref<1x384xf32, #tpu.memory_space<vmem>>, vector<1x384xf32>
    tpu.vector_store %arg6[%c0_11, %c0_12], %12 {strides = array<i32>} : memref<1x384xf32, #tpu.memory_space<vmem>>, vector<1x384xf32>,
    return
  }
  func.func @transform_0(%arg0: i32) -> (i32, i32) {
    %c0_i32 = arith.constant 0 : i32
    %c0_i32_0 = arith.constant 0 : i32
    return %arg0, %c0_i32 : i32, i32
  }
  func.func @transform_1(%arg0: i32) -> (i32, i32) {
    %c0_i32 = arith.constant 0 : i32
    %c0_i32_0 = arith.constant 0 : i32
    %c0_i32_1 = arith.constant 0 : i32
    return %c0_i32, %c0_i32_0 : i32, i32
  }
  func.func @transform_2(%arg0: i32) -> (i32, i32) {
    %c0_i32 = arith.constant 0 : i32
    %c0_i32_0 = arith.constant 0 : i32
    %c0_i32_1 = arith.constant 0 : i32
    return %c0_i32, %c0_i32_0 : i32, i32
  }
  func.func @transform_3(%arg0: i32) -> (i32, i32) {
    %c0_i32 = arith.constant 0 : i32
    %c0_i32_0 = arith.constant 0 : i32
    %c0_i32_1 = arith.constant 0 : i32
    return %c0_i32, %c0_i32_0 : i32, i32
  }
  func.func @transform_4(%arg0: i32) -> (i32, i32) {
    %c0_i32 = arith.constant 0 : i32
    %c0_i32_0 = arith.constant 0 : i32
    %c0_i32_1 = arith.constant 0 : i32
    return %c0_i32, %c0_i32_0 : i32, i32
  }
  func.func @transform_5(%arg0: i32) -> (i32, i32) {
    %c0_i32 = arith.constant 0 : i32
    %c0_i32_0 = arith.constant 0 : i32
    return %c0_i32, %arg0 : i32, i32
  }
}

</mosaic_0001>

<bundles_post_ra>
// kernel: tree_gate_forward.1
= control target key start
LH: loop header
LB: loop body
LE: loop exit
PB: predicated region body
PF: predicated region fallthrough
CT: control target
= control target key end

     0   :  { %s1541_s0 = inlined_call_operand.vmem [shape: f32[700,32], index: 0, kind: input, shape index: {}]   ;;  %s1542_s1 = inlined_call_operand.vmem [shape: f32[16,32], index: 1, kind: input, shape index: {}]   ;;  %s1543_s2 = inlined_call_operand.vmem [shape: f32[16,1], index: 2, kind: input, shape index: {}]   ;;  %s1544_s3 = inlined_call_operand.vmem [shape: f32[1,16], index: 3, kind: input, shape index: {}]   ;;  %s1545_s4 = inlined_call_operand.<no memory space> [shape: f32[1,1], index: 4, kind: input, shape index: {}]   ;;  %s1546_s5 = inlined_call_operand.hbm [shape: f32[1,700], index: 5, kind: output, shape index: {}]  }
   0x1   :  { %v10_v0 = vstv %s1545_s4 }
   0x2   :  { %11 = vst [vmem:[#allocation2] sm:$0x1] %v10_v0 }
   0x3   :  { %12 = vsyncpa [#allocation4], 0 }
   0x4   :  { %14 = vsyncpa [#allocation4 + $0x1], 0  ;;  %s1296_s20 = smov 0   ;;  %s1298_s21 = smov 0  }
   0x5   :  { %s1300_s22 = smov 0   ;;  %s1302_s23 = smov 0  }
   0x6 LB: > { %s880_s4 = sadd.s32 4294967295, %s1255_s23   ;;  %s881_s24 = sadd.s32 4294967294, %s1255_s23   ;;  %s1255_s23 = sphi %s1302_s23, %s1554_s23   ;;  %s1251_s22 = sphi %s1300_s22, %s1553_s22   ;;  %s1247_s21 = sphi %s1298_s21, %s1552_s21   ;;  %s1243_s20 = sphi %s1296_s20, %s1551_s20  }
   0x7   : > { %s1319_s25 = sadd.s32 1, %s1255_s23   ;;  %s137_s26 = sadd.s32 1, %s1251_s22 }
   0x8   : > { %s134_s27 = ssub.s32 %s1255_s23, %s1319_s25  ;;  %p147_p0 = scmp.ne.s32.totalorder %s1251_s22, %s1247_s21 }
   0x9   : > { %p135_p1 = scmp.eq.s32.totalorder %s134_s27, 0  ;;  %p148_p2 = scmp.eq.s32.totalorder %s880_s4, 1 }
   0xa   : > { %p153_p3 = scmp.ne.s32.totalorder %s1247_s21, %s1243_s20  ;;  %p154_p4 = scmp.eq.s32.totalorder %s881_s24, 1 }
   0xb   : > { %s1329_s28 = scalar_select %p135_p1, %s1251_s22, %s137_s26  }
   0xc   : > { %p1331_p5 = por %p148_p2, %p147_p0  ;;  %p1335_p6 = por %p154_p4, %p153_p3 }
   0xd   : > { %p884_p7 = scmp.ge.s32.totalorder %s1255_s23, 1  ;;  %p201_p8 = scmp.lt.s32.totalorder %s1255_s23, 3 }
   0xf   : > { %p202_p9 = pnand %p884_p7, %p201_p8 }
  0x10   : > { %s1341_s6 = smul.u32 (!%p202_p9), 48, %s880_s4  ;;  %vm310_vm0 = vcmask (!%p202_p9), 261120   ;;  %v1346_v1 = vld [vmem:[%s1542_s1] sm:$0xff] (!%p202_p9)  ;;  %v1257_v3 = vmov (!%p202_p9), 0   ;;  %v299_v4 = vld [vmem:[%s1543_s2 + $0x8] sm:$0xff] (!%p202_p9)  ;;  %vm1260_vm2 = vmmov (!%p202_p9), 0  }
  0x11   : > { %205 = sbr.rel (%p202_p9) target bundleno = 560 (0x230), region = 40  ;;  %v298_v2 = vld [vmem:[%s1543_s2] sm:$0xff] (!%p202_p9)  ;;  %976 = vmatprep.mubr.msk.f32.mxu0 (!%p202_p9), %vm310_vm0, %v1346_v1  ;;  %1033 = vmatprep.mubr.msk.f32.mxu1 (!%p202_p9), %vm310_vm0, %v1346_v1  ;;  %vm1367_vm1 = vmpackc.low (!%p202_p9), %vm310_vm0, %vm310_vm0  ;;  %vm630_vm3 = vcmask (!%p202_p9), 130048   ;;  %s230_s26 = sand.u32 (!%p202_p9), 1, %s1247_s21  }
  0x12   : > { %p238_p10 = scmp.lt.s32.totalorder (!%p202_p9), %s1341_s6, 87  ;;  %1191 = vset.pattern.permute.xlu0 (!%p202_p9), %v1257_v3  ;;  %1192 = vset.pattern.permute.xlu1 (!%p202_p9), %v1257_v3  ;;  %s1146_s27 = smul.u32 (!%p202_p9), 3, %s230_s26 }
  0x13   : > { %302 = vperm.xlu0 (!%p202_p9), %1191, %v298_v2   ;;  %s808_s12 = scalar_lea.sflag (!%p202_p9), [#allocation4], %s230_s26 }
  0x14   : > { %s232_s7 = scalar_lea.vmem (!%p202_p9), [#allocation3], %s1146_s27 }
  0x15   : > { %s822_s8 = sshll.u32 (!%p202_p9), %s232_s7, 4  ;;  %s1501_s8 = int_to_ptr.vmem [resolvable:$true] %s822_s8 }
  0x16   : > { %s1193_s13 = scalar_lea.vmem (!%p202_p9), %s1501_s8, 48 }
  0x17   : > { %307 = vperm.xlu0 (!%p202_p9), %1191, %v299_v4   ;;  %p1194_p11 = scmp.ne.s32.totalorder (!%p202_p9), %s1501_s8, %s1193_s13 }
  0x18   : > { %s239_s11 = scalar_select %p238_p10, %s1341_s6, 87 }
  0x19   : > { %p1195_p12 = pnand %p1194_p11, %p1331_p5 }
  0x1a   : > { %s885_s14 = sshll.u32 %s239_s11, 3  ;;  %s1499_s11 = scalar_lea.hbm %s1546_s5, %s1341_s6 }
  0x1b   : > { %s1363_s17 = scalar_lea.vmem %s1541_s0, %s885_s14  ;;  %p1196_p13 = pneg %p1195_p12 }
  0x1c   : > { %v266_v6 = vld [vmem:[%s1363_s17 + $0x80] sm:$0xff]  ;;  %v267_v7 = vld [vmem:[%s1363_s17 + $0x88] sm:$0xff]  ;;  %v268_v15 = vld [vmem:[%s1363_s17 + $0x90] sm:$0xff]  ;;  %s1262_s14 = smov [#allocation3]  }
  0x1d   : > { %v282_v8 = vld [vmem:[%s1363_s17 + $0x100] sm:$0xff]  ;;  %v1043_v9 = vpack.c.bf16 %v267_v7, %v266_v6  ;;  %v283_v10 = vld [vmem:[%s1363_s17 + $0x108] sm:$0xff]  ;;  %v269_v16 = vld [vmem:[%s1363_s17 + $0x98] sm:$0xff]  ;;  %s1197_s15 = sshll.u32 %s1262_s14, 4  ;;  %s1198_s15 = int_to_ptr.vmem [resolvable:$false] %s1197_s15 }
  0x1e   : > { %v250_v11 = vld [vmem:[%s1363_s17] sm:$0xff]  ;;  %v251_v12 = vld [vmem:[%s1363_s17 + $0x8] sm:$0xff]  ;;  %v1091_v13 = vpack.c.bf16 %v283_v10, %v282_v8  ;;  %v284_v17 = vld [vmem:[%s1363_s17 + $0x110] sm:$0xff]  ;;  %v1049_v18 = vpack.c.bf16 %v269_v16, %v268_v15  ;;  %s1199_s16 = scalar_lea.vmem %s1198_s15, 96  ;;  %p1200_p0 = scmp.lt.s32.totalorder %s1501_s8, %s1198_s15 }
  0x1f   : > { %v1046_v14 = vpack.c.bf16 %v251_v12, %v250_v11  ;;  %1045 = vmatprep.subr.msk.bf16.mxu0 %vm1367_vm1, %v1043_v9  ;;  %v285_v19 = vld [vmem:[%s1363_s17 + $0x118] sm:$0xff]  ;;  %v252_v21 = vld [vmem:[%s1363_s17 + $0x10] sm:$0xff]  ;;  %v270_v23 = vld [vmem:[%s1363_s17 + $0xa0] sm:$0xff]  ;;  %p1201_p1 = scmp.lt.s32.totalorder %s1199_s16, %s1193_s13 }
  0x20   : > { %1093 = vmatprep.subr.msk.bf16.mxu1 %vm1367_vm1, %v1091_v13  ;;  %v1097_v20 = vpack.c.bf16 %v285_v19, %v284_v17  ;;  %v253_v22 = vld [vmem:[%s1363_s17 + $0x18] sm:$0xff]  ;;  %v271_v24 = vld [vmem:[%s1363_s17 + $0xa8] sm:$0xff]  ;;  %v286_v25 = vld [vmem:[%s1363_s17 + $0x120] sm:$0xff]  ;;  %v1258_v17 = vmov 0.0|0.0  }
  0x21   : > { %1048 = vmatpush3.bf16.xpose.msk.msra.mxu0 %vm1367_vm1, %v1046_v14  ;;  %1096 = vmatpush3.bf16.xpose.msk.msra.mxu1 %vm1367_vm1, %v1091_v13  ;;  %v287_v26 = vld [vmem:[%s1363_s17 + $0x128] sm:$0xff]  ;;  %v1052_v27 = vpack.c.bf16 %v253_v22, %v252_v21  ;;  %v1055_v28 = vpack.c.bf16 %v271_v24, %v270_v23  ;;  %v254_v30 = vld [vmem:[%s1363_s17 + $0x20] sm:$0xff]  ;;  %v272_v32 = vld [vmem:[%s1363_s17 + $0xb0] sm:$0xff]  ;;  %p1202_p2 = por %p1201_p1, %p1200_p0 }
  0x22   : > { %1051 = vmatprep.subr.msk.bf16.mxu0 %vm1367_vm1, %v1049_v18  ;;  %1099 = vmatprep.subr.msk.bf16.mxu1 %vm1367_vm1, %v1097_v20  ;;  %v1103_v29 = vpack.c.bf16 %v287_v26, %v286_v25  ;;  %v255_v31 = vld [vmem:[%s1363_s17 + $0x28] sm:$0xff]  ;;  %v273_v33 = vld [vmem:[%s1363_s17 + $0xb8] sm:$0xff]  ;;  %v288_v34 = vld [vmem:[%s1363_s17 + $0x130] sm:$0xff]  ;;  %v1259_v18 = vmov 0.0  }
  0x23   : > { %v289_v35 = vld [vmem:[%s1363_s17 + $0x138] sm:$0xff]  ;;  %v1058_v36 = vpack.c.bf16 %v255_v31, %v254_v30  ;;  %v1061_v37 = vpack.c.bf16 %v273_v33, %v272_v32  ;;  %v256_v39 = vld [vmem:[%s1363_s17 + $0x30] sm:$0xff]  ;;  %v274_v41 = vld [vmem:[%s1363_s17 + $0xc0] sm:$0xff]  ;;  %p1203_p3 = pnand %p1202_p2, %p1196_p13 }
  0x24   : > { %v1109_v38 = vpack.c.bf16 %v289_v35, %v288_v34  ;;  %v257_v40 = vld [vmem:[%s1363_s17 + $0x38] sm:$0xff]  ;;  %v275_v42 = vld [vmem:[%s1363_s17 + $0xc8] sm:$0xff]  ;;  %v290_v43 = vld [vmem:[%s1363_s17 + $0x140] sm:$0xff] }
  0x25   : > { %v291_v44 = vld [vmem:[%s1363_s17 + $0x148] sm:$0xff]  ;;  %v1064_v45 = vpack.c.bf16 %v257_v40, %v256_v39  ;;  %v1067_v46 = vpack.c.bf16 %v275_v42, %v274_v41  ;;  %v258_v48 = vld [vmem:[%s1363_s17 + $0x40] sm:$0xff]  ;;  %v276_v50 = vld [vmem:[%s1363_s17 + $0xd0] sm:$0xff]  ;;  %v626_v42 = vlaneseq }
  0x26   : > { %v1115_v47 = vpack.c.bf16 %v291_v44, %v290_v43  ;;  %v259_v49 = vld [vmem:[%s1363_s17 + $0x48] sm:$0xff]  ;;  %v277_v51 = vld [vmem:[%s1363_s17 + $0xd8] sm:$0xff]  ;;  %v292_v52 = vld [vmem:[%s1363_s17 + $0x150] sm:$0xff] }
  0x27   : > { %v293_v53 = vld [vmem:[%s1363_s17 + $0x158] sm:$0xff]  ;;  %v1070_v54 = vpack.c.bf16 %v259_v49, %v258_v48  ;;  %v1073_v55 = vpack.c.bf16 %v277_v51, %v276_v50  ;;  %v260_v57 = vld [vmem:[%s1363_s17 + $0x50] sm:$0xff]  ;;  %v278_v59 = vld [vmem:[%s1363_s17 + $0xe0] sm:$0xff]  ;;  %v627_v43 = vshrl.u32 %v626_v42, 7  ;;  %vm804_vm4 = vcmp.lt.s32.totalorder %v626_v42, 384 }
  0x28   : > { %v1121_v56 = vpack.c.bf16 %v293_v53, %v292_v52  ;;  %v261_v58 = vld [vmem:[%s1363_s17 + $0x58] sm:$0xff]  ;;  %v279_v60 = vld [vmem:[%s1363_s17 + $0xe8] sm:$0xff]  ;;  %v294_v61 = vld [vmem:[%s1363_s17 + $0x160] sm:$0xff] }
  0x29   : > { %1054 = vmatpush3.bf16.xpose.msk.msra.mxu0 %vm1367_vm1, %v1052_v27  ;;  %1102 = vmatpush3.bf16.xpose.msk.msra.mxu1 %vm1367_vm1, %v1097_v20  ;;  %v295_v62 = vld [vmem:[%s1363_s17 + $0x168] sm:$0xff]  ;;  %v1076_v63 = vpack.c.bf16 %v261_v58, %v260_v57  ;;  %v1079_v0 = vpack.c.bf16 %v279_v60, %v278_v59  ;;  %v262_v3 = vld [vmem:[%s1363_s17 + $0x60] sm:$0xff]  ;;  %v280_v6 = vld [vmem:[%s1363_s17 + $0xf0] sm:$0xff]  ;;  %v628_v44 = vsub.s32 0, %v627_v43 }
  0x2a   : > { %1057 = vmatprep.subr.msk.bf16.mxu0 %vm1367_vm1, %v1055_v28  ;;  %1105 = vmatprep.subr.msk.bf16.mxu1 %vm1367_vm1, %v1103_v29  ;;  %v1127_v2 = vpack.c.bf16 %v295_v62, %v294_v61  ;;  %v263_v4 = vld [vmem:[%s1363_s17 + $0x68] sm:$0xff]  ;;  %v281_v7 = vld [vmem:[%s1363_s17 + $0xf8] sm:$0xff]  ;;  %v296_v8 = vld [vmem:[%s1363_s17 + $0x170] sm:$0xff] }
  0x2b   : > { %v297_v9 = vld [vmem:[%s1363_s17 + $0x178] sm:$0xff]  ;;  %v1082_v10 = vpack.c.bf16 %v263_v4, %v262_v3  ;;  %v1085_v11 = vpack.c.bf16 %v281_v7, %v280_v6  ;;  %v264_v13 = vld [vmem:[%s1363_s17 + $0x70] sm:$0xff]  ;;  %v249_v16 = vld [vmem:[%s1542_s1 + $0x8] sm:$0xff] }
  0x2c   : > { %v1133_v12 = vpack.c.bf16 %v297_v9, %v296_v8  ;;  %v265_v14 = vld [vmem:[%s1363_s17 + $0x78] sm:$0xff]  ;;  %v620_v19 = vld [vmem:[#allocation2] sm:$0x1] }
  0x2d   : > { %v1088_v15 = vpack.c.bf16 %v265_v14, %v264_v13  ;;  %623 = vperm.xlu1 %1192, %v620_v19   ;;  %v619_v40 = vld [vmem:[%s1544_s3] sm:$0x1] }
  0x31   : > { %1060 = vmatpush3.bf16.xpose.msk.msra.mxu0 %vm1367_vm1, %v1058_v36  ;;  %1108 = vmatpush3.bf16.xpose.msk.msra.mxu1 %vm1367_vm1, %v1103_v29 }
  0x32   : > { %1063 = vmatprep.subr.msk.bf16.mxu0 %vm1367_vm1, %v1061_v37  ;;  %1111 = vmatprep.subr.msk.bf16.mxu1 %vm1367_vm1, %v1109_v38 }
  0x39   : > { %1066 = vmatpush3.bf16.xpose.msk.msra.mxu0 %vm1367_vm1, %v1064_v45  ;;  %1114 = vmatpush3.bf16.xpose.msk.msra.mxu1 %vm1367_vm1, %v1109_v38  ;;  %v1261_v45 = vmov 1966171168  }
  0x3a   : > { %1069 = vmatprep.subr.msk.bf16.mxu0 %vm1367_vm1, %v1067_v46  ;;  %1117 = vmatprep.subr.msk.bf16.mxu1 %vm1367_vm1, %v1115_v47  ;;  %v780_v46 = vunpack.c.l.s4 %v1261_v45 }
  0x3c   : > { %v781_v51 = vunpack.c.0.s8 %v780_v46 }
  0x41   : > { %1072 = vmatpush3.bf16.xpose.msk.msra.mxu0 %vm1367_vm1, %v1070_v54  ;;  %1120 = vmatpush3.bf16.xpose.msk.msra.mxu1 %vm1367_vm1, %v1115_v47 }
  0x42   : > { %1075 = vmatprep.subr.msk.bf16.mxu0 %vm1367_vm1, %v1073_v55  ;;  %1123 = vmatprep.subr.msk.bf16.mxu1 %vm1367_vm1, %v1121_v56  ;;  %v784_v55 = vsub.s32 %v781_v51, %v627_v43 }
  0x49   : > { %1078 = vmatpush3.bf16.xpose.msk.msra.mxu0 %vm1367_vm1, %v1076_v63  ;;  %1126 = vmatpush3.bf16.xpose.msk.msra.mxu1 %vm1367_vm1, %v1121_v56 }
  0x4a   : > { %1081 = vmatprep.subr.msk.bf16.mxu0 %vm1367_vm1, %v1079_v0  ;;  %1129 = vmatprep.subr.msk.bf16.mxu1 %vm1367_vm1, %v1127_v2 }
  0x51   : > { %1084 = vmatpush3.bf16.xpose.msk.msra.mxu0 %vm1367_vm1, %v1082_v10  ;;  %1132 = vmatpush3.bf16.xpose.msk.msra.mxu1 %vm1367_vm1, %v1127_v2 }
  0x52   : > { %1087 = vmatprep.subr.msk.bf16.mxu0 %vm1367_vm1, %v1085_v11  ;;  %1135 = vmatprep.subr.msk.bf16.mxu1 %vm1367_vm1, %v1133_v12 }
  0x59   : > { %1090 = vmatpush3.bf16.xpose.msk.msra.mxu0 %vm1367_vm1, %v1088_v15  ;;  %1138 = vmatpush3.bf16.xpose.msk.msra.mxu1 %vm1367_vm1, %v1133_v12 }
  0x5a   : > { %1143 = vmatprep.subr.bf16.mxu0 %v1258_v17 }
  0x60   : > { %977 = vmatmul.mubr.msk.f32.vlgmr.msra.gmra.mrb[0].mxu0 %vm310_vm0, %v1346_v1  ;;  %1034 = vmatmul.mubr.msk.f32.vlgmr.msra.gmra.mrb[0].mxu1 %vm310_vm0, %v249_v16 }
  0x61   : > { %978 = vmatprep.mubr.msk.f32.mxu0 %vm310_vm0, %v249_v16  ;;  %698 = vmatprep.mubr.f32.mxu1 %v1259_v18 }
  0x64   : > { %979 = vmatmul.mubr.msk.f32.gmra.mrb[2].mxu0 %vm310_vm0, %v249_v16 }
  0x65   : > { %1040 = vmatprep.mubr.msk.f32.mxu0 %vm1260_vm2, %v1259_v18 }
  0x92   : > { %v303_v5 = vpop.permute.xlu0 %302 }
  0x96   : > { %v308_v20 = vpop.permute.xlu0 %307 }
  0xac   : > { %v624_v47 = vpop.permute.xlu1 %623 }
  0xad   : > { %v629_v49 = vrot.slane %v624_v47, %v628_v44 }
 0x133   : > { %v527_v21 = vpop.f32.mrb[0].mxu0  ;;  %v1035_v22 = vpop.f32.mrb[0].mxu1 }
 0x134   : > { %v529_v23 = vpop.f32.mrb[1].mxu0  ;;  %v610_v1 = vadd.f32 %v1035_v22, %v308_v20  ;;  %v604_v24 = vpop.f32.mrb[1].mxu1  ;;  %v528_v25 = vadd.f32 %v527_v21, %v303_v5 }
 0x135   : > { %v605_v26 = vadd.f32 %v604_v24, %v303_v5  ;;  %v530_v28 = vadd.f32 %v529_v23, %v303_v5 }
 0x136   : > { %v618_v27 = vmax.f32 %v610_v1, 0.0  ;;  %v613_v34 = vmax.f32 %v528_v25, 0.0 }
 0x137   : > { %v533_v29 = vpop.f32.mrb[2].mxu0  ;;  %v615_v30 = vmax.f32 %v605_v26, 0.0  ;;  %v614_v37 = vmax.f32 %v530_v28, 0.0 }
 0x138   : > { %v534_v31 = vadd.f32 %v533_v29, %v308_v20  ;;  %v535_v32 = vpop.f32.mrb[3].mxu0 }
 0x139   : > { %v536_v33 = vadd.f32 %v535_v32, %v308_v20  ;;  %v1144_v35 = vpack.c.bf16 %v618_v27, %v615_v30 }
 0x13a   : > { %v616_v36 = vmax.f32 %v534_v31, 0.0 }
 0x13b   : > { %v617_v38 = vmax.f32 %v536_v33, 0.0  ;;  %1145 = vmatpush3.bf16.msra.mxu0 %v1144_v35 }
 0x13c   : > { %v1141_v39 = vpack.c.bf16 %v616_v36, %v613_v34 }
 0x13d   : > { %v1139_v41 = vpack.c.bf16 %v617_v38, %v614_v37 }
 0x13e   : > { %1041 = vmatmul.mubr.msk.f32.vlgmr.msra.gmra.mrb[4].mxu0 %vm630_vm3, %v619_v40 }
 0x13f   : > { %1140 = vmatprep.subr.bf16.mxu1 %v1139_v41 }
 0x140   : > { %1142 = vmatpush1.bf16.msra.mxu1 %v1141_v39 }
 0x143   : > { %938 = vmatmul.mubr.msk.f32.vlgmr.msra.gmra.mrb[2].mxu1 %vm630_vm3, %v619_v40 }
 0x211   : > { %v771_v48 = vpop.f32.mrb[4].mxu0 }
 0x212   : > { %v1042_v50 = vpop.f32.mrb[5].mxu0  ;;  %v772_v57 = vadd.f32 %v771_v48, %v629_v49 }
 0x214   : > { %v792_v60 = vrot.slane %v772_v57, %v784_v55 }
 0x216   : > { %v700_v52 = vpop.f32.mrb[2].mxu1 }
 0x217   : > { %v701_v53 = vadd.f32 %v700_v52, %v629_v49  ;;  %v702_v54 = vpop.f32.mrb[3].mxu1 }
 0x218   : > { %v703_v56 = vadd.f32 %v702_v54, %v629_v49 }
 0x21a   : > { %v778_v58 = vcombine.low %v701_v53, %v703_v56 }
 0x21c   : > { %v785_v59 = vrot.slane %v778_v58, %v784_v55 }
 0x21e   : > { %v793_v61 = vcombine.low %v785_v59, %v792_v60 }
 0x220   : > { %v800_v62 = vrot.slane %v793_v61, %v784_v55 }
 0x222   : > { %806 = vst.msk [vmem:[%s232_s7] sm:$0x7] %vm804_vm4, %v800_v62 }
 0x223   : > { %1206 = shalt.err (!%p1203_p3)
}
 0x224   : > { %s1207_s6 = scalar_lea.hbm %s1499_s11, 48  ;;  %s1211_s19 = scalar_lea.hbm %s1546_s5, 96 }
 0x225   : > { %p1208_p4 = scmp.ne.s32.totalorder %s1499_s11, %s1207_s6  ;;  %p1212_p9 = scmp.lt.u32.totalorder %s1499_s11, %s1546_s5 }
 0x226   : > { %p1213_p10 = scmp.lt.u32.totalorder %s1211_s19, %s1207_s6  ;;  %p1215_p12 = scmp.lt.u32.totalorder %s1207_s6, %s1499_s11 }
 0x227   : > { %p1209_p7 = pnand %p1208_p4, %p1331_p5 }
 0x228   : > { %p1214_p11 = por %p1213_p10, %p1212_p9 }
 0x229   : > { %p1210_p8 = pneg %p1209_p7 }
 0x22a   : > { %p1216_p13 = por %p1215_p12, %p1214_p11 }
 0x22c   : > { %p1217_p0 = pnand %p1216_p13, %p1210_p8 }
 0x22e   : > { %1220 = shalt.err (!%p1217_p0)
}
 0x22f   : > { %1147 = dma.vmem_to_hbm [thread:$0]  (%p1331_p5), %s1501_s8, 48, %s1499_s11, %s808_s12  }
 0x230 PF: > { %p1153_p1 = scmp.ge.s32.totalorder %s1255_s23, 2  ;;  %s834_s26 = sand.u32 1, %s1243_s20  }
 0x231   : > { %s835_s27 = scalar_lea.sflag [#allocation4], %s834_s26 }
 0x232   : > { %p1150_p2 = pnand %p1153_p1, %p1335_p6 }
 0x234   : > { %1238 = dma.done.wait (!%p1150_p2), %s835_s27, 48  }
 0x235   : > { %1240 = vsyncadd (!%p1150_p2), %s835_s27, 4294967248  ;;  %p17_p3 = scmp.ge.s32.totalorder %s1319_s25, 4   ;;  %s1551_s20 = smov %s1247_s21 }
 0x236   : > { %s1552_s21 = smov %s1251_s22  ;;  %s1553_s22 = smov %s1329_s28 }
 0x237   : > { %s1554_s23 = smov %s1319_s25  ;;  %19 = sbr.rel (!%p17_p3) target bundleno = 6 (0x6), region = 75 }
 0x23e   :  { %840 = vsyncpa [#allocation4], 1 }
 0x23f   :  { %842 = vsyncpa [#allocation4 + $0x1], 1 }

</bundles_post_ra>
